<compile_context>
chip_gen: v5e
topology: v5e:2x2
jax: 0.10.0
libtpu: 0.0.40
codegen_flags: <defaults>
</compile_context>

<pallas_src>
import jax
import jax.numpy as jnp
from jax.experimental import pallas as pl
from jax.experimental.pallas import tpu as pltpu

ACT_BITS = 6
WEIGHT_BITS = 6
BIAS_BITS = 6
BN_EPS = 1e-5
LANE = 128


def _cdiv(a, b):
    return (a + b - 1) // b


def _round_up(x, m):
    return _cdiv(x, m) * m


# ----------------------------------------------------------------------------
# Host-side parameter preparation (runs once, outside the kernel)
# ----------------------------------------------------------------------------
def _fake_quant(v, bits):
    """Symmetric per-tensor fake-quant (host side only)."""
    n = 2.0 ** (bits - 1) - 1.0
    s = jnp.maximum(jnp.max(jnp.abs(v)) / n, 1e-8)
    return jnp.round(v / s) * s


def prepare_inference_params(params):
    """Fake-quantize weights/biases and fold BN (eval running stats) into the
    dense layers.  Weights stay (in, out) f32 here; the activation-scale fold
    + transpose + bf16 cast happens in fold_act_scales()."""
    (w1, b1, s1, t1, w2, b2, s2, t2, w3, b3, s3, t3, w4, b4) = params

    def fold_bn(w, b, scale, shift):
        wq = _fake_quant(w, WEIGHT_BITS)
        bq = _fake_quant(b, BIAS_BITS)
        if scale is None:
            return wq, bq
        # TODO(synk): BN scale is folded AFTER weight fake-quant, so effective
        #             weights leave the 6-bit grid (differs from true HAWQ
        #             integer-pipeline semantics).
        return wq * scale, bq * scale + shift

    return [
        fold_bn(w1, b1, s1, t1),
        fold_bn(w2, b2, s2, t2),
        fold_bn(w3, b3, s3, t3),
        fold_bn(w4, b4, None, None),
    ]


def calibrate_act_scales(x_calib, prep):
    """Stand-in for HAWQ's EMA activation ranges at eval time: one pure-JAX
    calibration pass producing a fixed per-layer activation scale."""
    n = 2.0 ** (ACT_BITS - 1) - 1.0
    scales = []

    def dyn_q(h):
        s = jnp.maximum(jnp.max(jnp.abs(h)) / n, 1e-8)
        scales.append(s)
        return jnp.round(h / s) * s

    h = dyn_q(x_calib)
    for li, (w, b) in enumerate(prep):
        h = jnp.dot(h, w) + b
        if li < 3:
            h = jnp.maximum(h, 0.0)
            h = dyn_q(h)
    return jnp.stack(scales).astype(jnp.float32)  # (4,)


def fold_act_scales(prep, act_scales):
    """Fold each layer's INPUT activation scale into that layer's weights and
    transpose to (out, in) bf16 for the batch-on-lanes kernel.  Returns the
    folded params plus precomputed inverse scales for SMEM prefetch."""
    folded = []
    for li, (w, b) in enumerate(prep):
        s = act_scales[li]
        w_t = (w * s).T.astype(jnp.bfloat16)          # (out, in) bf16, scale folded
        b_t = jnp.reshape(b, (-1, 1)).astype(jnp.float32)  # (out, 1) f32
        folded.append((w_t, b_t))
    inv_scales = (1.0 / act_scales).astype(jnp.float32)    # (4,)
    return folded, inv_scales


def reference_forward(x, folded, inv_scales):
    """Pure-JAX reference performing the same folded-scale math as the kernel
    (for correctness checking)."""
    n = 2.0 ** (ACT_BITS - 1) - 1.0
    h = x
    for li, (w_t, b_t) in enumerate(folded):
        q = jnp.clip(jnp.round(h * inv_scales[li]), -n, n)
        h = jnp.dot(q.astype(jnp.bfloat16), w_t.T,
                    preferred_element_type=jnp.float32) + b_t.reshape(1, -1)
        if li < 3:
            h = jnp.maximum(h, 0.0)
    return jax.nn.softmax(h, axis=1)


# ----------------------------------------------------------------------------
# Pallas kernel (batch on lanes: every activation tile is (features, TB))
# ----------------------------------------------------------------------------
def mlp_kernel(
    inv_ref,                          # SMEM (4,) f32 precomputed 1/act_scale
    x_ref,                            # (16, TB) f32
    w1_ref, b1_ref,                   # (64, 16) bf16, (64, 1) f32
    w2_ref, b2_ref,                   # (32, 64) bf16, (32, 1) f32
    w3_ref, b3_ref,                   # (32, 32) bf16, (32, 1) f32
    w4_ref, b4_ref,                   # (5, 32)  bf16, (5, 1)  f32
    o_ref,                            # (5, TB)  f32
):
    n = 2.0 ** (ACT_BITS - 1) - 1.0

    def qint(h, inv_s):
        # Integer quantization codes only; the scale is folded into the next
        # layer's weights on the host.  |code| <= 31 -> exact in bf16.
        return jnp.clip(jnp.round(h * inv_s), -n, n)

    def layer(w_ref, q, b_ref):
        # bf16 operands on the MXU, f32 accumulate + f32 (BN-folded) bias.
        return (
            jnp.dot(w_ref[...], q.astype(jnp.bfloat16),
                    preferred_element_type=jnp.float32)
            + b_ref[...]
        )

    # quant_input
    q = qint(x_ref[...], inv_ref[0])

    # dense_1 (+BN1 folded) -> dropout(id) -> ReLU -> quant_act_1
    h = layer(w1_ref, q, b1_ref)
    h = jnp.maximum(h, 0.0)
    q = qint(h, inv_ref[1])

    # dense_2 (+BN2 folded) -> dropout(id) -> ReLU -> quant_act_2
    h = layer(w2_ref, q, b2_ref)
    h = jnp.maximum(h, 0.0)
    q = qint(h, inv_ref[2])

    # dense_3 (+BN3 folded) -> dropout(id) -> ReLU -> quant_act_3
    h = layer(w3_ref, q, b3_ref)
    h = jnp.maximum(h, 0.0)
    q = qint(h, inv_ref[3])

    # dense_4 -> softmax over the 5 classes (sublane axis in this layout)
    logits = layer(w4_ref, q, b4_ref)
    m = jnp.max(logits, axis=0, keepdims=True)
    e = jnp.exp(logits - m)
    denom = jnp.sum(e, axis=0, keepdims=True)
    o_ref[...] = e / denom            # exact divide: row sums within f32 eps


# ----------------------------------------------------------------------------
# Wrapper
# ----------------------------------------------------------------------------
def _choose_tile(B, block_b):
    """Pick the batch tile (lane axis): multiple of 128, padding bounded to
    < one tile, and >= min(8, enough) grid steps so v7x's two TensorCores and
    the pipeline ramp are used for large batches."""
    nb = max(_cdiv(B, block_b), min(8, _cdiv(B, 512)), 1)
    tb = _round_up(_cdiv(B, nb), LANE)
    nb = _cdiv(B, tb)
    return tb, nb * tb


def qthreelayer_forward(x, folded, inv_scales, *, block_b=4096):
    """x: (B, 16) f32.  folded: list of (w_t (out,in) bf16, b (out,1) f32).
    inv_scales: (4,) f32 (1 / static activation scale per QuantAct)."""
    B, n_in = x.shape
    n_out = folded[-1][0].shape[0]

    TB, B_pad = _choose_tile(B, block_b)
    nb = B_pad // TB

    # Layout plumbing in the wrapper: batch onto the lane axis.
    xt = x.T                                          # (16, B)
    if B_pad != B:
        xt = jnp.pad(xt, ((0, 0), (0, B_pad - B)))

    flat_params = []
    param_specs = []
    for w, b in folded:
        flat_params.extend([w, b])
        # Weights/biases resident across the batch grid (same block every step).
        param_specs.append(pl.BlockSpec(w.shape, lambda i, s: (0, 0)))
        param_specs.append(pl.BlockSpec(b.shape, lambda i, s: (0, 0)))

    grid_spec = pltpu.PrefetchScalarGridSpec(
        num_scalar_prefetch=1,                         # inv_scales -> SMEM
        grid=(nb,),
        in_specs=[pl.BlockSpec((n_in, TB), lambda i, s: (0, i))] + param_specs,
        out_specs=pl.BlockSpec((n_out, TB), lambda i, s: (0, i)),
    )

    out_t = pl.pallas_call(
        mlp_kernel,
        out_shape=jax.ShapeDtypeStruct((n_out, B_pad), jnp.float32),
        grid_spec=grid_spec,
        compiler_params=pltpu.CompilerParams(
            dimension_semantics=("parallel",),
        ),
    )(inv_scales, xt, *flat_params)

    return out_t[:, :B].T                              # back to (B, 5)


# ----------------------------------------------------------------------------
# Deterministic synthetic parameters (linear weights stored (in, out))
# ----------------------------------------------------------------------------
def make_params(key):
    dims = [(16, 64), (64, 32), (32, 32), (32, 5)]
    keys = jax.random.split(key, 32)
    ki = iter(keys)
    params = []
    for li, (fin, fout) in enumerate(dims):
        w = jax.random.normal(next(ki), (fin, fout), jnp.float32) * (1.0 / jnp.sqrt(fin))
        b = jax.random.normal(next(ki), (1, fout), jnp.float32) * 0.1
        params.extend([w, b])
        if li < 3:  # BN after dense_1/2/3 only (eval mode: folded to scale/shift)
            gamma = 1.0 + 0.1 * jax.random.normal(next(ki), (1, fout), jnp.float32)
            beta = 0.1 * jax.random.normal(next(ki), (1, fout), jnp.float32)
            rmean = 0.1 * jax.random.normal(next(ki), (1, fout), jnp.float32)
            rvar = jnp.abs(1.0 + 0.1 * jax.random.normal(next(ki), (1, fout), jnp.float32))
            scale = gamma / jnp.sqrt(rvar + BN_EPS)
            shift = beta - rmean * scale
            params.extend([scale, shift])
    return tuple(params)


if __name__ == "__main__":
    key = jax.random.PRNGKey(0)
    kx, kp = jax.random.split(key)

    # jet-tagging input: (batch, 16 features)
    x = jax.random.normal(kx, (8, 16), jnp.float32)
    raw_params = make_params(kp)

    # One-time host-side prep: quantize + BN-fold weights, calibrate activation
    # scales (stands in for HAWQ's EMA ranges at eval), fold act scales into
    # the next layer's weights and precompute inverse scales for SMEM prefetch.
    prep = prepare_inference_params(raw_params)
    act_scales = calibrate_act_scales(x, prep)
    folded, inv_scales = fold_act_scales(prep, act_scales)

    out = qthreelayer_forward(x, folded, inv_scales)
    out = jax.block_until_ready(out)

    assert out.shape == (8, 5)
    # softmax rows must sum to 1 (exact divide in the kernel)
    assert bool(jnp.all(jnp.abs(jnp.sum(out, axis=1) - 1.0) < 1e-4))
    # match the pure-JAX folded-scale reference
    ref = reference_forward(x, folded, inv_scales)
    assert bool(jnp.max(jnp.abs(out - ref)) < 5e-2)
    print("KERNEL_OK")
</pallas_src>

<mosaic_0001>
module attributes {stable_mosaic.version = 11 : i64} {
  func.func @mlp_kernel(%arg0: i32, %arg1: memref<4xf32, #tpu.memory_space<smem>>, %arg2: memref<16x128xf32, #tpu.memory_space<vmem>>, %arg3: memref<64x16xbf16, #tpu.memory_space<vmem>>, %arg4: memref<64x1xf32, #tpu.memory_space<vmem>>, %arg5: memref<32x64xbf16, #tpu.memory_space<vmem>>, %arg6: memref<32x1xf32, #tpu.memory_space<vmem>>, %arg7: memref<32x32xbf16, #tpu.memory_space<vmem>>, %arg8: memref<32x1xf32, #tpu.memory_space<vmem>>, %arg9: memref<5x32xbf16, #tpu.memory_space<vmem>>, %arg10: memref<5x1xf32, #tpu.memory_space<vmem>>, %arg11: memref<5x128xf32, #tpu.memory_space<vmem>>) attributes {dimension_semantics = [#tpu.dimension_semantics<parallel>], iteration_bounds = array<i64: 1>, scalar_prefetch = 1 : i64, scratch_operands = 0 : i64, tpu.core_type = #tpu.core_type<tc>, window_params = [{transform_indices = @transform_0, window_bounds = array<i64: 16, 128>}, {pipeline_mode = #tpu.pipeline_mode<synchronous>, transform_indices = @transform_1, window_bounds = array<i64: 64, 16>}, {pipeline_mode = #tpu.pipeline_mode<synchronous>, transform_indices = @transform_2, window_bounds = array<i64: 64, 1>}, {pipeline_mode = #tpu.pipeline_mode<synchronous>, transform_indices = @transform_3, window_bounds = array<i64: 32, 64>}, {pipeline_mode = #tpu.pipeline_mode<synchronous>, transform_indices = @transform_4, window_bounds = array<i64: 32, 1>}, {pipeline_mode = #tpu.pipeline_mode<synchronous>, transform_indices = @transform_5, window_bounds = array<i64: 32, 32>}, {pipeline_mode = #tpu.pipeline_mode<synchronous>, transform_indices = @transform_6, window_bounds = array<i64: 32, 1>}, {pipeline_mode = #tpu.pipeline_mode<synchronous>, transform_indices = @transform_7, window_bounds = array<i64: 5, 32>}, {pipeline_mode = #tpu.pipeline_mode<synchronous>, transform_indices = @transform_8, window_bounds = array<i64: 5, 1>}, {transform_indices = @transform_9, window_bounds = array<i64: 5, 128>}]} {
    %c0 = arith.constant 0 : index
    %c0_0 = arith.constant 0 : index
    %0 = vector.load %arg2[%c0, %c0_0] : memref<16x128xf32, #tpu.memory_space<vmem>>, vector<16x128xf32>
    %c0_1 = arith.constant 0 : index
    %1 = memref.load %arg1[%c0_1] : memref<4xf32, #tpu.memory_space<smem>>
    %2 = vector.broadcast %1 : f32 to vector<16x128xf32>
    %3 = arith.mulf %0, %2 : vector<16x128xf32>
    %4 = math.roundeven %3 : vector<16x128xf32>
    %cst = arith.constant -3.100000e+01 : f32
    %cst_2 = arith.constant 3.100000e+01 : f32
    %5 = vector.broadcast %cst : f32 to vector<16x128xf32>
    %6 = arith.maximumf %5, %4 : vector<16x128xf32>
    %7 = vector.broadcast %cst_2 : f32 to vector<16x128xf32>
    %8 = arith.minimumf %7, %6 : vector<16x128xf32>
    %c0_3 = arith.constant 0 : index
    %c0_4 = arith.constant 0 : index
    %9 = vector.load %arg3[%c0_3, %c0_4] : memref<64x16xbf16, #tpu.memory_space<vmem>>, vector<64x16xbf16>
    %10 = arith.truncf %8 : vector<16x128xf32> to vector<16x128xbf16>
    %cst_5 = arith.constant dense<0.000000e+00> : vector<64x128xf32>
    %11 = tpu.matmul %9, %10, %cst_5 {dimension_numbers = #tpu.dot_dimension_numbers<[1], [0], [0], [1], [0, 0, 1, 1], [], []>} : vector<64x16xbf16>, vector<16x128xbf16>, vector<64x128xf32> -> vector<64x128xf32>
    %c0_6 = arith.constant 0 : index
    %c0_7 = arith.constant 0 : index
    %12 = vector.load %arg4[%c0_6, %c0_7] : memref<64x1xf32, #tpu.memory_space<vmem>>, vector<64x1xf32>
    %13 = vector.broadcast %12 : vector<64x1xf32> to vector<64x128xf32>
    %14 = arith.addf %11, %13 : vector<64x128xf32>
    %cst_8 = arith.constant 0.000000e+00 : f32
    %15 = vector.broadcast %cst_8 : f32 to vector<64x128xf32>
    %16 = arith.maximumf %14, %15 : vector<64x128xf32>
    %c1 = arith.constant 1 : index
    %17 = memref.load %arg1[%c1] : memref<4xf32, #tpu.memory_space<smem>>
    %18 = vector.broadcast %17 : f32 to vector<64x128xf32>
    %19 = arith.mulf %16, %18 : vector<64x128xf32>
    %20 = math.roundeven %19 : vector<64x128xf32>
    %cst_9 = arith.constant -3.100000e+01 : f32
    %cst_10 = arith.constant 3.100000e+01 : f32
    %21 = vector.broadcast %cst_9 : f32 to vector<64x128xf32>
    %22 = arith.maximumf %21, %20 : vector<64x128xf32>
    %23 = vector.broadcast %cst_10 : f32 to vector<64x128xf32>
    %24 = arith.minimumf %23, %22 : vector<64x128xf32>
    %c0_11 = arith.constant 0 : index
    %c0_12 = arith.constant 0 : index
    %25 = vector.load %arg5[%c0_11, %c0_12] : memref<32x64xbf16, #tpu.memory_space<vmem>>, vector<32x64xbf16>
    %26 = arith.truncf %24 : vector<64x128xf32> to vector<64x128xbf16>
    %cst_13 = arith.constant dense<0.000000e+00> : vector<32x128xf32>
    %27 = tpu.matmul %25, %26, %cst_13 {dimension_numbers = #tpu.dot_dimension_numbers<[1], [0], [0], [1], [0, 0, 1, 1], [], []>} : vector<32x64xbf16>, vector<64x128xbf16>, vector<32x128xf32> -> vector<32x128xf32>
    %c0_14 = arith.constant 0 : index
    %c0_15 = arith.constant 0 : index
    %28 = vector.load %arg6[%c0_14, %c0_15] : memref<32x1xf32, #tpu.memory_space<vmem>>, vector<32x1xf32>
    %29 = vector.broadcast %28 : vector<32x1xf32> to vector<32x128xf32>
    %30 = arith.addf %27, %29 : vector<32x128xf32>
    %cst_16 = arith.constant 0.000000e+00 : f32
    %31 = vector.broadcast %cst_16 : f32 to vector<32x128xf32>
    %32 = arith.maximumf %30, %31 : vector<32x128xf32>
    %c2 = arith.constant 2 : index
    %33 = memref.load %arg1[%c2] : memref<4xf32, #tpu.memory_space<smem>>
    %34 = vector.broadcast %33 : f32 to vector<32x128xf32>
    %35 = arith.mulf %32, %34 : vector<32x128xf32>
    %36 = math.roundeven %35 : vector<32x128xf32>
    %cst_17 = arith.constant -3.100000e+01 : f32
    %cst_18 = arith.constant 3.100000e+01 : f32
    %37 = vector.broadcast %cst_17 : f32 to vector<32x128xf32>
    %38 = arith.maximumf %37, %36 : vector<32x128xf32>
    %39 = vector.broadcast %cst_18 : f32 to vector<32x128xf32>
    %40 = arith.minimumf %39, %38 : vector<32x128xf32>
    %c0_19 = arith.constant 0 : index
    %c0_20 = arith.constant 0 : index
    %41 = vector.load %arg7[%c0_19, %c0_20] : memref<32x32xbf16, #tpu.memory_space<vmem>>, vector<32x32xbf16>
    %42 = arith.truncf %40 : vector<32x128xf32> to vector<32x128xbf16>
    %cst_21 = arith.constant dense<0.000000e+00> : vector<32x128xf32>
    %43 = tpu.matmul %41, %42, %cst_21 {dimension_numbers = #tpu.dot_dimension_numbers<[1], [0], [0], [1], [0, 0, 1, 1], [], []>} : vector<32x32xbf16>, vector<32x128xbf16>, vector<32x128xf32> -> vector<32x128xf32>
    %c0_22 = arith.constant 0 : index
    %c0_23 = arith.constant 0 : index
    %44 = vector.load %arg8[%c0_22, %c0_23] : memref<32x1xf32, #tpu.memory_space<vmem>>, vector<32x1xf32>
    %45 = vector.broadcast %44 : vector<32x1xf32> to vector<32x128xf32>
    %46 = arith.addf %43, %45 : vector<32x128xf32>
    %cst_24 = arith.constant 0.000000e+00 : f32
    %47 = vector.broadcast %cst_24 : f32 to vector<32x128xf32>
    %48 = arith.maximumf %46, %47 : vector<32x128xf32>
    %c3 = arith.constant 3 : index
    %49 = memref.load %arg1[%c3] : memref<4xf32, #tpu.memory_space<smem>>
    %50 = vector.broadcast %49 : f32 to vector<32x128xf32>
    %51 = arith.mulf %48, %50 : vector<32x128xf32>
    %52 = math.roundeven %51 : vector<32x128xf32>
    %cst_25 = arith.constant -3.100000e+01 : f32
    %cst_26 = arith.constant 3.100000e+01 : f32
    %53 = vector.broadcast %cst_25 : f32 to vector<32x128xf32>
    %54 = arith.maximumf %53, %52 : vector<32x128xf32>
    %55 = vector.broadcast %cst_26 : f32 to vector<32x128xf32>
    %56 = arith.minimumf %55, %54 : vector<32x128xf32>
    %c0_27 = arith.constant 0 : index
    %c0_28 = arith.constant 0 : index
    %57 = vector.load %arg9[%c0_27, %c0_28] : memref<5x32xbf16, #tpu.memory_space<vmem>>, vector<5x32xbf16>
    %58 = arith.truncf %56 : vector<32x128xf32> to vector<32x128xbf16>
    %cst_29 = arith.constant dense<0.000000e+00> : vector<5x128xf32>
    %59 = tpu.matmul %57, %58, %cst_29 {dimension_numbers = #tpu.dot_dimension_numbers<[1], [0], [0], [1], [0, 0, 1, 1], [], []>} : vector<5x32xbf16>, vector<32x128xbf16>, vector<5x128xf32> -> vector<5x128xf32>
    %c0_30 = arith.constant 0 : index
    %c0_31 = arith.constant 0 : index
    %60 = vector.load %arg10[%c0_30, %c0_31] : memref<5x1xf32, #tpu.memory_space<vmem>>, vector<5x1xf32>
    %61 = vector.broadcast %60 : vector<5x1xf32> to vector<5x128xf32>
    %62 = arith.addf %59, %61 : vector<5x128xf32>
    %cst_32 = arith.constant dense<0xFF800000> : vector<128xf32>
    %63 = vector.multi_reduction <maximumf>, %62, %cst_32 [0] : vector<5x128xf32> to vector<128xf32>
    %64 = vector.shape_cast %63 : vector<128xf32> to vector<1x128xf32>
    %65 = vector.broadcast %64 : vector<1x128xf32> to vector<5x128xf32>
    %66 = arith.subf %62, %65 : vector<5x128xf32>
    %67 = math.exp %66 : vector<5x128xf32>
    %cst_33 = arith.constant dense<0.000000e+00> : vector<128xf32>
    %68 = vector.multi_reduction <add>, %67, %cst_33 [0] : vector<5x128xf32> to vector<128xf32>
    %69 = vector.shape_cast %68 : vector<128xf32> to vector<1x128xf32>
    %70 = vector.broadcast %69 : vector<1x128xf32> to vector<5x128xf32>
    %71 = arith.divf %67, %70 : vector<5x128xf32>
    %c0_34 = arith.constant 0 : index
    %c0_35 = arith.constant 0 : index
    %72 = vector.load %arg11[%c0_34, %c0_35] : memref<5x128xf32, #tpu.memory_space<vmem>>, vector<5x128xf32>
    tpu.vector_store %arg11[%c0_34, %c0_35], %71 {strides = array<i32>} : memref<5x128xf32, #tpu.memory_space<vmem>>, vector<5x128xf32>,
    return
  }
  func.func @transform_0(%arg0: i32, %arg1: memref<4xf32, #tpu.memory_space<smem>>) -> (i32, i32) {
    %c0_i32 = arith.constant 0 : i32
    %c0_i32_0 = arith.constant 0 : i32
    return %c0_i32, %arg0 : i32, i32
  }
  func.func @transform_1(%arg0: i32, %arg1: memref<4xf32, #tpu.memory_space<smem>>) -> (i32, i32) {
    %c0_i32 = arith.constant 0 : i32
    %c0_i32_0 = arith.constant 0 : i32
    %c0_i32_1 = arith.constant 0 : i32
    return %c0_i32, %c0_i32_0 : i32, i32
  }
  func.func @transform_2(%arg0: i32, %arg1: memref<4xf32, #tpu.memory_space<smem>>) -> (i32, i32) {
    %c0_i32 = arith.constant 0 : i32
    %c0_i32_0 = arith.constant 0 : i32
    %c0_i32_1 = arith.constant 0 : i32
    return %c0_i32, %c0_i32_0 : i32, i32
  }
  func.func @transform_3(%arg0: i32, %arg1: memref<4xf32, #tpu.memory_space<smem>>) -> (i32, i32) {
    %c0_i32 = arith.constant 0 : i32
    %c0_i32_0 = arith.constant 0 : i32
    %c0_i32_1 = arith.constant 0 : i32
    return %c0_i32, %c0_i32_0 : i32, i32
  }
  func.func @transform_4(%arg0: i32, %arg1: memref<4xf32, #tpu.memory_space<smem>>) -> (i32, i32) {
    %c0_i32 = arith.constant 0 : i32
    %c0_i32_0 = arith.constant 0 : i32
    %c0_i32_1 = arith.constant 0 : i32
    return %c0_i32, %c0_i32_0 : i32, i32
  }
  func.func @transform_5(%arg0: i32, %arg1: memref<4xf32, #tpu.memory_space<smem>>) -> (i32, i32) {
    %c0_i32 = arith.constant 0 : i32
    %c0_i32_0 = arith.constant 0 : i32
    %c0_i32_1 = arith.constant 0 : i32
    return %c0_i32, %c0_i32_0 : i32, i32
  }
  func.func @transform_6(%arg0: i32, %arg1: memref<4xf32, #tpu.memory_space<smem>>) -> (i32, i32) {
    %c0_i32 = arith.constant 0 : i32
    %c0_i32_0 = arith.constant 0 : i32
    %c0_i32_1 = arith.constant 0 : i32
    return %c0_i32, %c0_i32_0 : i32, i32
  }
  func.func @transform_7(%arg0: i32, %arg1: memref<4xf32, #tpu.memory_space<smem>>) -> (i32, i32) {
    %c0_i32 = arith.constant 0 : i32
    %c0_i32_0 = arith.constant 0 : i32
    %c0_i32_1 = arith.constant 0 : i32
    return %c0_i32, %c0_i32_0 : i32, i32
  }
  func.func @transform_8(%arg0: i32, %arg1: memref<4xf32, #tpu.memory_space<smem>>) -> (i32, i32) {
    %c0_i32 = arith.constant 0 : i32
    %c0_i32_0 = arith.constant 0 : i32
    %c0_i32_1 = arith.constant 0 : i32
    return %c0_i32, %c0_i32_0 : i32, i32
  }
  func.func @transform_9(%arg0: i32, %arg1: memref<4xf32, #tpu.memory_space<smem>>) -> (i32, i32) {
    %c0_i32 = arith.constant 0 : i32
    %c0_i32_0 = arith.constant 0 : i32
    return %c0_i32, %arg0 : i32, i32
  }
}

</mosaic_0001>

<bundles_post_ra>
// kernel: tpu_custom_call.1
= control target key start
LH: loop header
LB: loop body
LE: loop exit
PB: predicated region body
PF: predicated region fallthrough
CT: control target
= control target key end

     0   :  { %s734_s16 = smov [#allocation3]   ;;  %s889_s0 = inlined_call_operand.vmem [shape: f32[4], index: 0, kind: input, shape index: {}]   ;;  %s890_s1 = inlined_call_operand.vmem [shape: f32[16,128], index: 1, kind: input, shape index: {}]   ;;  %s891_s2 = inlined_call_operand.vmem [shape: bf16[64,16], index: 2, kind: input, shape index: {}]   ;;  %s892_s3 = inlined_call_operand.vmem [shape: f32[64,1], index: 3, kind: input, shape index: {}]   ;;  %s893_s4 = inlined_call_operand.vmem [shape: bf16[32,64], index: 4, kind: input, shape index: {}]   ;;  %s894_s5 = inlined_call_operand.vmem [shape: f32[32,1], index: 5, kind: input, shape index: {}]   ;;  %s895_s6 = inlined_call_operand.vmem [shape: bf16[32,32], index: 6, kind: input, shape index: {}]   ;;  %s896_s7 = inlined_call_operand.vmem [shape: f32[32,1], index: 7, kind: input, shape index: {}]   ;;  %s897_s8 = inlined_call_operand.vmem [shape: bf16[5,32], index: 8, kind: input, shape index: {}]   ;;  %s898_s9 = inlined_call_operand.vmem [shape: f32[5,1], index: 9, kind: input, shape index: {}]   ;;  %s899_s10 = inlined_call_operand.hbm [shape: f32[5,128], index: 10, kind: output, shape index: {}]  }
   0x1   :  { %s16_s15 = sshll.u32 %s889_s0, 4  ;;  %s17_s15 = int_to_ptr.vmem [resolvable:$true] %s16_s15 }
   0x2   :  { %19 = dma.vmem_to_smem %s17_s15, 16, %s734_s16, [#allocation2] }
   0x3   :  { %730 = dma.done.wait [#allocation2], 16 }
   0x4   :  { %731 = vsyncadd [#allocation2], 4294967280 }
   0x5   :  { %22 = sfence }
   0x6   :  { %v70_v0 = vld [vmem:[%s892_s3 + $0x30] sm:$0xff]  ;;  %s45_s19 = sld [smem:[#allocation3]]  ;;  %v735_v1 = vmov 0   ;;  %v68_v2 = vld [vmem:[%s892_s3 + $0x20] sm:$0xff] }
   0x7   :  { %687 = vset.pattern.permute.xlu0 %v735_v1  ;;  %688 = vset.pattern.permute.xlu1 %v735_v1 }
   0x8   :  { %104 = vperm.xlu0 %687, %v70_v0   ;;  %94 = vperm.xlu1 %688, %v68_v2  }
   0x9   :  { %689 = vset.pattern.permute.xlu2 %v735_v1 }
   0xa   :  { %23 = vsyncpa [#allocation5], 0  ;;  %v43_v3 = vld [vmem:[%s890_s1] sm:$0xff]  ;;  %v44_v4 = vld [vmem:[%s890_s1 + $0x8] sm:$0xff]  ;;  %vm132_vm2 = vcmask 130048   ;;  %s491_s18 = sld [smem:[#allocation3 + $0x1]] }
   0xb   :  { %v71_v8 = vld [vmem:[%s892_s3 + $0x38] sm:$0xff]  ;;  %v69_v9 = vld [vmem:[%s892_s3 + $0x28] sm:$0xff]  ;;  %v64_v21 = vld [vmem:[%s892_s3] sm:$0xff]  ;;  %vm258_vm11 = vcmask 523264   ;;  %s510_s20 = sld [smem:[#allocation3 + $0x2]]  ;;  %s460_s28 = sshll.u32 %s899_s10, 4  ;;  %s461_s28 = int_to_ptr.hbm [resolvable:$true] %s460_s28 }
   0xc   :  { %v46_v5 = vstv %s45_s19  ;;  %v65_v22 = vld [vmem:[%s892_s3 + $0x8] sm:$0xff]  ;;  %v531_v29 = vld [vmem:[%s891_s2] sm:$0xff]  ;;  %v534_v30 = vld [vmem:[%s891_s2 + $0x18] sm:$0xff]  ;;  %s525_s23 = sld [smem:[#allocation3 + $0x3]] }
   0xd   :  { %v47_v6 = vmul.f32 %v46_v5, %v43_v3  ;;  %v48_v7 = vmul.f32 %v46_v5, %v44_v4  ;;  %v227_v31 = vld [vmem:[%s894_s5 + $0x18] sm:$0xff]  ;;  %v224_v32 = vld [vmem:[%s894_s5] sm:$0xff]  ;;  %v66_v33 = vld [vmem:[%s892_s3 + $0x10] sm:$0xff] }
   0xe   :  { %84 = vperm.xlu2 %689, %v66_v33   ;;  %v314_v34 = vld [vmem:[%s896_s7 + $0x10] sm:$0xff]  ;;  %v315_v35 = vld [vmem:[%s896_s7 + $0x18] sm:$0xff]  ;;  %v532_v37 = vld [vmem:[%s891_s2 + $0x8] sm:$0xff] }
   0xf   :  { %v542_v10 = vcvt.f32.s32 %v47_v6  ;;  %v540_v11 = vand.u32 2147483647, %v47_v6  ;;  %v550_v12 = vcvt.f32.s32 %v48_v7  ;;  %v545_v14 = vand.u32 2147483648, %v47_v6  ;;  %v67_v36 = vld [vmem:[%s892_s3 + $0x18] sm:$0xff]  ;;  %v313_v38 = vld [vmem:[%s896_s7 + $0x8] sm:$0xff]  ;;  %v226_v40 = vld [vmem:[%s894_s5 + $0x10] sm:$0xff] }
  0x10   :  { %109 = vperm.xlu0 %687, %v71_v8   ;;  %99 = vperm.xlu1 %688, %v69_v9   ;;  %v548_v15 = vand.u32 2147483647, %v48_v7  ;;  %v553_v17 = vand.u32 2147483648, %v48_v7  ;;  %v397_v39 = vld [vmem:[%s898_s9] sm:$0x1f]  ;;  %v225_v41 = vld [vmem:[%s894_s5 + $0x8] sm:$0xff]  ;;  %v183_v51 = vstv %s491_s18 }
  0x11   :  { %v543_v13 = vcvt.s32.f32 %v542_v10  ;;  %v551_v16 = vcvt.s32.f32 %v550_v12  ;;  %vm541_vm0 = vcmp.lt.f32.partialorder %v540_v11, 8388608.0  ;;  %v533_v42 = vld [vmem:[%s891_s2 + $0x10] sm:$0xff]  ;;  %v312_v43 = vld [vmem:[%s896_s7] sm:$0xff] }
  0x12   :  { %vm549_vm1 = vcmp.lt.f32.partialorder %v548_v15, 8388608.0 }
  0x13   :  { %v544_v18 = vand.u32 2147483647, %v543_v13  ;;  %v552_v19 = vand.u32 2147483647, %v551_v16 }
  0x15   :  { %v546_v20 = vor.u32 %v545_v14, %v544_v18  ;;  %v554_v23 = vor.u32 %v553_v17, %v552_v19 }
  0x16   :  { %89 = vperm.xlu2 %689, %v67_v36  }
  0x17   :  { %v547_v24 = vsel %vm541_vm0, %v546_v20, %v47_v6  ;;  %v555_v25 = vsel %vm549_vm1, %v554_v23, %v48_v7  ;;  %vm346_vm0 = vcmask 261120  }
  0x18   :  { %v469_v26 = vclamps-f32 %v547_v24, 31.0  ;;  %74 = vperm.xlu0 %687, %v64_v21   ;;  %79 = vperm.xlu1 %688, %v65_v22   ;;  %v470_v27 = vclamps-f32 %v555_v25, 31.0 }
  0x1a   :  { %v63_v28 = vpack.c.bf16 %v470_v27, %v469_v26 }
  0x1c   :  { %152 = vmatpush.bf16.msra.mxu0 %v63_v28  ;;  %539 = vmatpush.bf16.msra.mxu3 %v63_v28 }
  0x1e   :  { %240 = vperm.xlu2 %689, %v226_v40  }
  0x1f   :  { %487 = vmatmul.msk.bf16.vlgmr.msra.gmra.mxu0 %vm132_vm2, %v531_v29  ;;  %490 = vmatmul.msk.bf16.vlgmr.msra.gmra.mxu3 %vm132_vm2, %v534_v30 }
  0x20   :  { %245 = vperm.xlu0 %687, %v227_v31   ;;  %230 = vperm.xlu1 %688, %v224_v32  }
  0x26   :  { %235 = vperm.xlu2 %689, %v225_v41  }
  0x28   :  { %328 = vperm.xlu0 %687, %v314_v34   ;;  %333 = vperm.xlu1 %688, %v315_v35  }
  0x2e   :  { %318 = vperm.xlu2 %689, %v312_v43  }
  0x2f   :  { %488 = vmatmul.msk.bf16.gmra.mxu0 %vm132_vm2, %v532_v37 }
  0x30   :  { %323 = vperm.xlu0 %687, %v313_v38   ;;  %400 = vperm.xlu1 %688, %v397_v39  }
  0x3f   :  { %489 = vmatmul.msk.bf16.gmra.mxu0 %vm132_vm2, %v533_v42 }
  0x68   :  { %v85_v58 = vpop.permute.xlu2 %84 }
  0x70   :  { %v90_v10 = vpop.permute.xlu2 %89 }
  0x7a   :  { %v105_v45 = vpop.permute.xlu0 %104  ;;  %v95_v47 = vpop.permute.xlu1 %94 }
  0x82   :  { %v110_v54 = vpop.permute.xlu0 %109  ;;  %v100_v60 = vpop.permute.xlu1 %99 }
  0x8a   :  { %v80_v11 = vpop.permute.xlu1 %79  ;;  %v75_v15 = vpop.permute.xlu0 %74 }
  0x9c   :  { %v154_v44 = vpop.f32.mrf.mxu0 }
  0x9d   :  { %v155_v21 = vadd.f32 %v154_v44, %v75_v15 }
  0x9f   :  { %v174_v29 = vmax.f32 %v155_v21, 0.0 }
  0xa1   :  { %v184_v35 = vmul.f32 %v183_v51, %v174_v29 }
  0xa2   :  { %v169_v46 = vpop.f32.mrf.mxu3 }
  0xa3   :  { %v170_v48 = vadd.f32 %v169_v46, %v105_v45  ;;  %v558_v43 = vcvt.f32.s32 %v184_v35 }
  0xa4   :  { %v156_v49 = vpop.f32.mrf.mxu0 }
  0xa5   :  { %v180_v50 = vmax.f32 %v170_v48, 0.0  ;;  %v157_v18 = vadd.f32 %v156_v49, %v80_v11 }
  0xa7   :  { %v190_v52 = vmul.f32 %v183_v51, %v180_v50  ;;  %v175_v26 = vmax.f32 %v157_v18, 0.0 }
  0xa9   :  { %v606_v53 = vcvt.f32.s32 %v190_v52  ;;  %v609_v63 = vand.u32 2147483648, %v190_v52  ;;  %v604_v0 = vand.u32 2147483647, %v190_v52  ;;  %v185_v32 = vmul.f32 %v183_v51, %v175_v26  ;;  %v536_v26 = vld [vmem:[%s893_s4 + $0x8] sm:$0xff] }
  0xaa   :  { %v171_v55 = vpop.f32.mrf.mxu3 }
  0xab   :  { %v172_v56 = vadd.f32 %v171_v55, %v110_v54  ;;  %v607_v57 = vcvt.s32.f32 %v606_v53  ;;  %vm605_vm3 = vcmp.lt.f32.partialorder %v604_v0, 8388608.0  ;;  %v566_v40 = vcvt.f32.s32 %v185_v32 }
  0xac   :  { %v159_v59 = vpop.f32.mrf.mxu0  ;;  %v559_v53 = vcvt.s32.f32 %v558_v43 }
  0xad   :  { %v181_v61 = vmax.f32 %v172_v56, 0.0  ;;  %v608_v62 = vand.u32 2147483647, %v607_v57  ;;  %v160_v16 = vadd.f32 %v159_v59, %v85_v58 }
  0xaf   :  { %v191_v1 = vmul.f32 %v183_v51, %v181_v61  ;;  %v610_v2 = vor.u32 %v609_v63, %v608_v62  ;;  %v176_v24 = vmax.f32 %v160_v16, 0.0 }
  0xb1   :  { %v614_v3 = vcvt.f32.s32 %v191_v1  ;;  %v612_v4 = vand.u32 2147483647, %v191_v1  ;;  %v617_v6 = vand.u32 2147483648, %v191_v1  ;;  %v611_v8 = vsel %vm605_vm3, %v610_v2, %v190_v52 }
  0xb2   :  { %v498_v14 = vclamps-f32 %v611_v8, 31.0  ;;  %v186_v30 = vmul.f32 %v183_v51, %v176_v24 }
  0xb3   :  { %v615_v5 = vcvt.s32.f32 %v614_v3  ;;  %vm613_vm4 = vcmp.lt.f32.partialorder %v612_v4, 8388608.0 }
  0xb4   :  { %v161_v7 = vpop.f32.mrf.mxu0  ;;  %v574_v37 = vcvt.f32.s32 %v186_v30  ;;  %v577_v63 = vand.u32 2147483648, %v186_v30 }
  0xb5   :  { %v616_v9 = vand.u32 2147483647, %v615_v5  ;;  %v162_v12 = vadd.f32 %v161_v7, %v90_v10  ;;  %v569_v5 = vand.u32 2147483648, %v185_v32 }
  0xb6   :  { %v575_v46 = vcvt.s32.f32 %v574_v37 }
  0xb7   :  { %v618_v13 = vor.u32 %v617_v6, %v616_v9  ;;  %v177_v20 = vmax.f32 %v162_v12, 0.0  ;;  %v564_v6 = vand.u32 2147483647, %v185_v32  ;;  %v561_v9 = vand.u32 2147483648, %v184_v35 }
  0xb8   :  { %v576_v56 = vand.u32 2147483647, %v575_v46 }
  0xb9   :  { %v619_v17 = vsel %vm613_vm4, %v618_v13, %v191_v1  ;;  %v187_v27 = vmul.f32 %v183_v51, %v177_v20  ;;  %v560_v1 = vand.u32 2147483647, %v559_v53  ;;  %v556_v13 = vand.u32 2147483647, %v184_v35 }
  0xba   :  { %v499_v19 = vclamps-f32 %v619_v17, 31.0  ;;  %v578_v4 = vor.u32 %v577_v63, %v576_v56  ;;  %vm565_vm9 = vcmp.lt.f32.partialorder %v564_v6, 8388608.0 }
  0xbb   :  { %v582_v33 = vcvt.f32.s32 %v187_v27  ;;  %v585_v57 = vand.u32 2147483648, %v187_v27  ;;  %v580_v59 = vand.u32 2147483647, %v187_v27  ;;  %v562_v15 = vor.u32 %v561_v9, %v560_v1 }
  0xbc   :  { %v164_v22 = vpop.f32.mrf.mxu0  ;;  %v223_v23 = vpack.c.bf16 %v499_v19, %v498_v14  ;;  %vm557_vm10 = vcmp.lt.f32.partialorder %v556_v13, 8388608.0 }
  0xbd   :  { %v165_v25 = vadd.f32 %v164_v22, %v95_v47  ;;  %v583_v42 = vcvt.s32.f32 %v582_v33  ;;  %v567_v47 = vcvt.s32.f32 %v566_v40  ;;  %vm581_vm7 = vcmp.lt.f32.partialorder %v580_v59, 8388608.0 }
  0xbe   :  { %269 = vmatpush.bf16.msra.mxu1 %v223_v23  ;;  %v563_v20 = vsel %vm557_vm10, %v562_v15, %v184_v35 }
  0xbf   :  { %v178_v28 = vmax.f32 %v165_v25, 0.0  ;;  %v584_v50 = vand.u32 2147483647, %v583_v42  ;;  %v492_v23 = vclamps-f32 %v563_v20, 31.0  ;;  %v535_v25 = vld [vmem:[%s893_s4] sm:$0xff] }
  0xc1   :  { %v188_v31 = vmul.f32 %v183_v51, %v178_v28  ;;  %v586_v0 = vor.u32 %v585_v57, %v584_v50 }
  0xc3   :  { %v590_v34 = vcvt.f32.s32 %v188_v31  ;;  %v593_v49 = vand.u32 2147483648, %v188_v31  ;;  %v588_v52 = vand.u32 2147483647, %v188_v31  ;;  %v587_v8 = vsel %vm581_vm7, %v586_v0, %v187_v27  ;;  %v241_v27 = vpop.permute.xlu2 %240 }
  0xc4   :  { %v166_v36 = vpop.f32.mrf.mxu0  ;;  %v495_v17 = vclamps-f32 %v587_v8, 31.0 }
  0xc5   :  { %v167_v38 = vadd.f32 %v166_v36, %v100_v60  ;;  %v591_v39 = vcvt.s32.f32 %v590_v34  ;;  %v568_v60 = vand.u32 2147483647, %v567_v47  ;;  %vm589_vm5 = vcmp.lt.f32.partialorder %v588_v52, 8388608.0 }
  0xc7   :  { %v179_v41 = vmax.f32 %v167_v38, 0.0  ;;  %v592_v45 = vand.u32 2147483647, %v591_v39  ;;  %v570_v10 = vor.u32 %v569_v5, %v568_v60  ;;  %v289_v38 = vstv %s510_s20 }
  0xc9   :  { %v189_v44 = vmul.f32 %v183_v51, %v179_v41  ;;  %v594_v54 = vor.u32 %v593_v49, %v592_v45  ;;  %v572_v51 = vand.u32 2147483647, %v186_v30  ;;  %v571_v18 = vsel %vm565_vm9, %v570_v10, %v185_v32  ;;  %v231_v32 = vpop.permute.xlu1 %230  ;;  %v246_v45 = vpop.permute.xlu0 %245 }
  0xca   :  { %v493_v22 = vclamps-f32 %v571_v18, 31.0  ;;  %v537_v18 = vld [vmem:[%s895_s6] sm:$0xff] }
  0xcb   :  { %v598_v48 = vcvt.f32.s32 %v189_v44  ;;  %v596_v58 = vand.u32 2147483647, %v189_v44  ;;  %v601_v62 = vand.u32 2147483648, %v189_v44  ;;  %v595_v2 = vsel %vm589_vm5, %v594_v54, %v188_v31 }
  0xcc   :  { %v496_v11 = vclamps-f32 %v595_v2, 31.0  ;;  %vm573_vm8 = vcmp.lt.f32.partialorder %v572_v51, 8388608.0  ;;  %v220_v24 = vpack.c.bf16 %v493_v22, %v492_v23  ;;  %vm419_vm5 = vcmask 1044480  }
  0xcd   :  { %v599_v55 = vcvt.s32.f32 %v598_v48  ;;  %vm597_vm6 = vcmp.lt.f32.partialorder %v596_v58, 8388608.0  ;;  %v579_v14 = vsel %vm573_vm8, %v578_v4, %v186_v30  ;;  %v236_v30 = vpop.permute.xlu2 %235 }
  0xce   :  { %v494_v19 = vclamps-f32 %v579_v14, 31.0 }
  0xcf   :  { %v600_v61 = vand.u32 2147483647, %v599_v55 }
  0xd0   :  { %v221_v21 = vpack.c.bf16 %v495_v17, %v494_v19  ;;  %v538_v19 = vld [vmem:[%s895_s6 + $0x8] sm:$0xff] }
  0xd1   :  { %v602_v3 = vor.u32 %v601_v62, %v600_v61  ;;  %v329_v20 = vpop.permute.xlu0 %328 }
  0xd3   :  { %v603_v7 = vsel %vm597_vm6, %v602_v3, %v189_v44 }
  0xd4   :  { %v497_v12 = vclamps-f32 %v603_v7, 31.0 }
  0xd6   :  { %v222_v16 = vpack.c.bf16 %v497_v12, %v496_v11 }
  0xd8   :  { %270 = vmatpush.bf16.msra.mxu1 %v222_v16 }
  0xd9   :  { %v324_v23 = vpop.permute.xlu0 %323 }
  0xdc   :  { %271 = vmatpush.bf16.msra.mxu1 %v221_v21 }
  0xe0   :  { %272 = vmatpush.bf16.msra.mxu1 %v220_v24 }
  0xe3   :  { %508 = vmatmul.msk.bf16.vlgmr.msra.gmra.mxu1 %vm258_vm11, %v535_v25  ;;  %v319_v25 = vpop.permute.xlu2 %318 }
  0xf3   :  { %509 = vmatmul.msk.bf16.gmra.mxu1 %vm258_vm11, %v536_v26 }
 0x160   :  { %v274_v28 = vpop.f32.mrf.mxu1 }
 0x161   :  { %v275_v33 = vadd.f32 %v274_v28, %v231_v32 }
 0x163   :  { %v284_v36 = vmax.f32 %v275_v33, 0.0 }
 0x165   :  { %v290_v41 = vmul.f32 %v289_v38, %v284_v36 }
 0x167   :  { %v622_v47 = vcvt.f32.s32 %v290_v41  ;;  %v625_v3 = vand.u32 2147483648, %v290_v41  ;;  %v620_v5 = vand.u32 2147483647, %v290_v41 }
 0x168   :  { %v276_v29 = vpop.f32.mrf.mxu1 }
 0x169   :  { %v277_v31 = vadd.f32 %v276_v29, %v236_v30  ;;  %v623_v55 = vcvt.s32.f32 %v622_v47  ;;  %vm621_vm15 = vcmp.lt.f32.partialorder %v620_v5, 8388608.0 }
 0x16b   :  { %v285_v34 = vmax.f32 %v277_v31, 0.0  ;;  %v624_v62 = vand.u32 2147483647, %v623_v55  ;;  %v377_v31 = vstv %s525_s23 }
 0x16d   :  { %v291_v39 = vmul.f32 %v289_v38, %v285_v34  ;;  %v626_v8 = vor.u32 %v625_v3, %v624_v62 }
 0x16f   :  { %v630_v43 = vcvt.f32.s32 %v291_v39  ;;  %v633_v63 = vand.u32 2147483648, %v291_v39  ;;  %v628_v51 = vand.u32 2147483647, %v291_v39  ;;  %v627_v13 = vsel %vm621_vm15, %v626_v8, %v290_v41 }
 0x170   :  { %v279_v35 = vpop.f32.mrf.mxu1  ;;  %v511_v16 = vclamps-f32 %v627_v13, 31.0 }
 0x171   :  { %v280_v37 = vadd.f32 %v279_v35, %v241_v27  ;;  %v631_v52 = vcvt.s32.f32 %v630_v43  ;;  %vm629_vm14 = vcmp.lt.f32.partialorder %v628_v51, 8388608.0 }
 0x173   :  { %v286_v40 = vmax.f32 %v280_v37, 0.0  ;;  %v632_v58 = vand.u32 2147483647, %v631_v52 }
 0x175   :  { %v292_v42 = vmul.f32 %v289_v38, %v286_v40  ;;  %v634_v4 = vor.u32 %v633_v63, %v632_v58 }
 0x177   :  { %v638_v44 = vcvt.f32.s32 %v292_v42  ;;  %v641_v56 = vand.u32 2147483648, %v292_v42  ;;  %v636_v59 = vand.u32 2147483647, %v292_v42  ;;  %v635_v10 = vsel %vm629_vm14, %v634_v4, %v291_v39 }
 0x178   :  { %v281_v46 = vpop.f32.mrf.mxu1  ;;  %v512_v15 = vclamps-f32 %v635_v10, 31.0 }
 0x179   :  { %v282_v48 = vadd.f32 %v281_v46, %v246_v45  ;;  %v639_v49 = vcvt.s32.f32 %v638_v44  ;;  %vm637_vm12 = vcmp.lt.f32.partialorder %v636_v59, 8388608.0 }
 0x17a   :  { %v310_v17 = vpack.c.bf16 %v512_v15, %v511_v16 }
 0x17b   :  { %v287_v50 = vmax.f32 %v282_v48, 0.0  ;;  %v640_v54 = vand.u32 2147483647, %v639_v49 }
 0x17d   :  { %v293_v53 = vmul.f32 %v289_v38, %v287_v50  ;;  %v642_v60 = vor.u32 %v641_v56, %v640_v54  ;;  %v334_v38 = vpop.permute.xlu1 %333 }
 0x17f   :  { %v646_v57 = vcvt.f32.s32 %v293_v53  ;;  %v644_v0 = vand.u32 2147483647, %v293_v53  ;;  %v649_v2 = vand.u32 2147483648, %v293_v53  ;;  %v643_v6 = vsel %vm637_vm12, %v642_v60, %v292_v42 }
 0x180   :  { %v513_v11 = vclamps-f32 %v643_v6, 31.0 }
 0x181   :  { %v647_v61 = vcvt.s32.f32 %v646_v57  ;;  %vm645_vm13 = vcmp.lt.f32.partialorder %v644_v0, 8388608.0 }
 0x183   :  { %v648_v1 = vand.u32 2147483647, %v647_v61 }
 0x185   :  { %v650_v7 = vor.u32 %v649_v2, %v648_v1 }
 0x187   :  { %v651_v9 = vsel %vm645_vm13, %v650_v7, %v293_v53 }
 0x188   :  { %v514_v12 = vclamps-f32 %v651_v9, 31.0 }
 0x18a   :  { %v311_v14 = vpack.c.bf16 %v514_v12, %v513_v11  ;;  %v394_v11 = vld [vmem:[%s897_s8] sm:$0x7]  ;;  %v401_v12 = vpop.permute.xlu1 %400  ;;  %s736_s8 = smov [#allocation4]  }
 0x18b   :  { %s458_s25 = sshll.u32 %s736_s8, 4  ;;  %s459_s25 = int_to_ptr.vmem [resolvable:$true] %s458_s25 }
 0x18c   :  { %359 = vmatpush.bf16.msra.mxu2 %v311_v14 }
 0x190   :  { %360 = vmatpush.bf16.msra.mxu2 %v310_v17 }
 0x193   :  { %523 = vmatmul.msk.bf16.vlgmr.msra.gmra.mxu2 %vm346_vm0, %v537_v18 }
 0x1a3   :  { %524 = vmatmul.msk.bf16.gmra.mxu2 %vm346_vm0, %v538_v19 }
 0x216   :  { %v362_v21 = vpop.f32.mrf.mxu2 }
 0x217   :  { %v363_v26 = vadd.f32 %v362_v21, %v319_v25 }
 0x219   :  { %v372_v29 = vmax.f32 %v363_v26, 0.0 }
 0x21b   :  { %v378_v34 = vmul.f32 %v377_v31, %v372_v29 }
 0x21d   :  { %v654_v40 = vcvt.f32.s32 %v378_v34  ;;  %v657_v61 = vand.u32 2147483648, %v378_v34  ;;  %v652_v63 = vand.u32 2147483647, %v378_v34 }
 0x21e   :  { %v364_v22 = vpop.f32.mrf.mxu2 }
 0x21f   :  { %v365_v24 = vadd.f32 %v364_v22, %v324_v23  ;;  %v655_v47 = vcvt.s32.f32 %v654_v40  ;;  %vm653_vm4 = vcmp.lt.f32.partialorder %v652_v63, 8388608.0 }
 0x221   :  { %v373_v27 = vmax.f32 %v365_v24, 0.0  ;;  %v656_v55 = vand.u32 2147483647, %v655_v47 }
 0x223   :  { %v379_v32 = vmul.f32 %v377_v31, %v373_v27  ;;  %v658_v1 = vor.u32 %v657_v61, %v656_v55 }
 0x225   :  { %v662_v36 = vcvt.f32.s32 %v379_v32  ;;  %v665_v56 = vand.u32 2147483648, %v379_v32  ;;  %v660_v58 = vand.u32 2147483647, %v379_v32  ;;  %v659_v6 = vsel %vm653_vm4, %v658_v1, %v378_v34 }
 0x226   :  { %v367_v28 = vpop.f32.mrf.mxu2  ;;  %v526_v9 = vclamps-f32 %v659_v6, 31.0 }
 0x227   :  { %v368_v30 = vadd.f32 %v367_v28, %v329_v20  ;;  %v663_v44 = vcvt.s32.f32 %v662_v36  ;;  %vm661_vm3 = vcmp.lt.f32.partialorder %v660_v58, 8388608.0 }
 0x229   :  { %v374_v33 = vmax.f32 %v368_v30, 0.0  ;;  %v664_v50 = vand.u32 2147483647, %v663_v44 }
 0x22b   :  { %v380_v35 = vmul.f32 %v377_v31, %v374_v33  ;;  %v666_v62 = vor.u32 %v665_v56, %v664_v50 }
 0x22d   :  { %v670_v37 = vcvt.f32.s32 %v380_v35  ;;  %v673_v49 = vand.u32 2147483648, %v380_v35  ;;  %v668_v52 = vand.u32 2147483647, %v380_v35  ;;  %v667_v3 = vsel %vm661_vm3, %v666_v62, %v379_v32 }
 0x22e   :  { %v369_v39 = vpop.f32.mrf.mxu2  ;;  %v527_v8 = vclamps-f32 %v667_v3, 31.0 }
 0x22f   :  { %v370_v41 = vadd.f32 %v369_v39, %v334_v38  ;;  %v671_v42 = vcvt.s32.f32 %v670_v37  ;;  %vm669_vm1 = vcmp.lt.f32.partialorder %v668_v52, 8388608.0 }
 0x230   :  { %v395_v10 = vpack.c.bf16 %v527_v8, %v526_v9 }
 0x231   :  { %v375_v43 = vmax.f32 %v370_v41, 0.0  ;;  %v672_v46 = vand.u32 2147483647, %v671_v42 }
 0x233   :  { %v381_v45 = vmul.f32 %v377_v31, %v375_v43  ;;  %v674_v53 = vor.u32 %v673_v49, %v672_v46 }
 0x235   :  { %v678_v48 = vcvt.f32.s32 %v381_v45  ;;  %v676_v57 = vand.u32 2147483647, %v381_v45  ;;  %v681_v60 = vand.u32 2147483648, %v381_v45  ;;  %v675_v0 = vsel %vm669_vm1, %v674_v53, %v380_v35 }
 0x236   :  { %v528_v4 = vclamps-f32 %v675_v0, 31.0 }
 0x237   :  { %v679_v54 = vcvt.s32.f32 %v678_v48  ;;  %vm677_vm2 = vcmp.lt.f32.partialorder %v676_v57, 8388608.0 }
 0x239   :  { %v680_v59 = vand.u32 2147483647, %v679_v54 }
 0x23b   :  { %v682_v51 = vor.u32 %v681_v60, %v680_v59 }
 0x23d   :  { %v683_v2 = vsel %vm677_vm2, %v682_v51, %v381_v45 }
 0x23e   :  { %v529_v5 = vclamps-f32 %v683_v2, 31.0 }
 0x240   :  { %v396_v7 = vpack.c.bf16 %v529_v5, %v528_v4 }
 0x242   :  { %412 = vmatpush.bf16.msrb.mxu3 %v396_v7 }
 0x246   :  { %413 = vmatpush.bf16.msrb.mxu3 %v395_v10 }
 0x249   :  { %530 = vmatmul.msk.bf16.vlgmr.msrb.gmra.mxu3 %vm346_vm0, %v394_v11 }
 0x2cc   :  { %v415_v13 = vpop.f32.mrf.mxu3 }
 0x2cd   :  { %v416_v14 = vadd.f32 %v415_v13, %v401_v12 }
 0x2cf   :  { %v420_v15 = vsel %vm419_vm5, %v416_v14, -inf }
 0x2d0   :  { %v421_v16 = vrot.slane %v420_v15, 4 }
 0x2d2   :  { %v422_v17 = vmax.f32 %v420_v15, %v421_v16 }
 0x2d4   :  { %v423_v18 = vrot.slane %v422_v17, 2  ;;  %v417_v19 = vpop.f32.mrf.mxu3 }
 0x2d6   :  { %v424_v20 = vmax.f32 %v422_v17, %v423_v18 }
 0x2d8   :  { %v425_v21 = vrot.slane %v424_v20, 1 }
 0x2da   :  { %v426_v22 = vmax.f32 %v424_v20, %v425_v21 }
 0x2dc   :  { %v427_v23 = vsub.f32 %v416_v14, %v426_v22 }
 0x2de   :  { %v428_v24 = vmul.f32 1.442695, %v427_v23 }
 0x2e0   :  { %690 = vpow2.f32 %v428_v24 }
 0x2e6   :  { %v691_v25 = vpop.eup %690 }
 0x2e7   :  { %v430_v26 = vsel %vm419_vm5, %v691_v25, 0.0 }
 0x2e8   :  { %v431_v27 = vrot.slane %v430_v26, 4 }
 0x2ea   :  { %v432_v28 = vadd.f32 %v431_v27, %v430_v26 }
 0x2ec   :  { %v433_v29 = vrot.slane %v432_v28, 2 }
 0x2ee   :  { %v434_v30 = vadd.f32 %v433_v29, %v432_v28 }
 0x2f0   :  { %v435_v31 = vrot.slane %v434_v30, 1 }
 0x2f2   :  { %v436_v32 = vadd.f32 %v435_v31, %v434_v30 }
 0x2f4   :  { %692 = vrcp.f32 %v436_v32  ;;  %v448_v36 = vand.u32 2147483648, %v436_v32  ;;  %v446_v38 = vand.u32 2147483647, %v436_v32  ;;  %vm442_vm7 = vweird.f32 %v436_v32 }
 0x2f6   :  { %v449_v40 = vor.u32 1.1754944e-38, %v448_v36  ;;  %vm447_vm9 = vcmp.eq.f32.partialorder %v446_v38, 8.507059e+37 }
 0x2fa   :  { %v693_v33 = vpop.eup %692 }
 0x2fb   :  { %v438_v34 = vmul.f32 %v693_v33, %v436_v32  ;;  %vm443_vm6 = vweird.f32 %v693_v33 }
 0x2fc   :  { %vm444_vm8 = vmor %vm442_vm7, %vm443_vm6 }
 0x2fd   :  { %v439_v35 = vsub.f32 1.0, %v438_v34 }
 0x2ff   :  { %v440_v37 = vmul.f32 %v693_v33, %v439_v35 }
 0x301   :  { %v441_v39 = vadd.f32 %v693_v33, %v440_v37 }
 0x303   :  { %v445_v41 = vsel %vm444_vm8, %v693_v33, %v441_v39 }
 0x304   :  { %v450_v42 = vsel %vm447_vm9, %v449_v40, %v445_v41 }
 0x305   :  { %v451_v43 = vmul.f32 %v691_v25, %v450_v42 }
 0x307   :  { %452 = vst [vmem:[#allocation4] sm:$0x1f] %v451_v43 }
 0x308   :  { %463 = dma.vmem_to_hbm [thread:$0]  %s459_s25, 128, %s461_s28, [#allocation5]  }
 0x309   :  { %732 = dma.done.wait [#allocation5], 128  }
 0x30a   :  { %733 = vsyncadd [#allocation5], 4294967168 }
 0x30b   :  { %468 = vsyncpa [#allocation5], 1 }

</bundles_post_ra>
